<compile_context>
chip_gen: v7x
topology: tpu7x:2x2x1
jax: 0.10.0
libtpu: 0.0.40
codegen_flags: <defaults>
</compile_context>

<pallas_src>
import functools
import math

import jax
import jax.numpy as jnp
from jax import lax
from jax.experimental import pallas as pl
from jax.experimental.pallas import tpu as pltpu

_NEG_INF = -1e30                     # finite "-inf": no exp(-inf - -inf) NaNs


@functools.lru_cache(maxsize=None)
def _vmem_limit_bytes():
    """Generation-aware scoped-VMEM limit (<=96 MB v5e/v6e, ~48 MB v7x)."""
    try:
        cap = pltpu.get_tpu_info().vmem_capacity_bytes
        return int(min(96 * 1024 * 1024, cap * 3 // 4))
    except Exception:
        return 48 * 1024 * 1024


def _pick_tile(n, target):
    """Largest divisor of n <= target, preferring multiples of 128, then 8."""
    if n <= target:
        return n
    for base in (128, 8):
        t = (target // base) * base
        while t >= base:
            if n % t == 0:
                return t
            t -= base
    # TODO(synk): pad n_tokens to a multiple of 128 instead of falling back to
    # the full sequence length (can blow VMEM for long, divisor-free T).
    return n


# ---------------------------------------------------------------------------
# Kernel 1: QKV lift directly into head-major layout.
#   x_ref : (1, tt, E)   w_ref : (3, 1, E, D)   q/k/v : (1, 1, tt, D)
# ---------------------------------------------------------------------------
def _qkv_kernel(x_ref, w_ref, q_ref, k_ref, v_ref, *, scale):
    x = x_ref[0]                                           # (tt, E)
    q = jnp.dot(x, w_ref[0, 0], preferred_element_type=jnp.float32) * scale
    k = jnp.dot(x, w_ref[1, 0], preferred_element_type=jnp.float32)
    v = jnp.dot(x, w_ref[2, 0], preferred_element_type=jnp.float32)
    q_ref[0, 0] = q.astype(q_ref.dtype)
    k_ref[0, 0] = k.astype(k_ref.dtype)
    v_ref[0, 0] = v.astype(v_ref.dtype)


# ---------------------------------------------------------------------------
# Kernel 2: flash attention (online softmax) fused with head-merge + proj.
#   grid = (B, T//tq, H, T//tk); head and kv axes are reductions.
#   q_ref : (1,1,tq,D)  k/v_ref : (1,1,tk,D)  wo_ref : (1,D,E)  o_ref : (1,tq,E)
# ---------------------------------------------------------------------------
def _flash_proj_kernel(q_ref, k_ref, v_ref, wo_ref, o_ref,
                       m_scr, l_scr, acc_scr, out_scr, *, tq, tk, approx):
    qi = pl.program_id(1)
    h = pl.program_id(2)
    ki = pl.program_id(3)
    n_heads = pl.num_programs(2)
    n_kv = pl.num_programs(3)

    @pl.when(jnp.logical_and(h == 0, ki == 0))
    def _init_out():
        out_scr[...] = jnp.zeros(out_scr.shape, dtype=out_scr.dtype)

    @pl.when(ki == 0)
    def _init_head():
        m_scr[...] = jnp.full(m_scr.shape, _NEG_INF, dtype=m_scr.dtype)
        l_scr[...] = jnp.zeros(l_scr.shape, dtype=l_scr.dtype)
        acc_scr[...] = jnp.zeros(acc_scr.shape, dtype=acc_scr.dtype)

    def _scores():
        # q @ k.T (scale already folded into q) without materializing k.T.
        return lax.dot_general(q_ref[0, 0], k_ref[0, 0],
                               (((1,), (1,)), ((), ())),
                               preferred_element_type=jnp.float32)  # (tq, tk)

    def _online_update(s):
        v = v_ref[0, 0]
        m_prev = m_scr[...]
        m_new = jnp.maximum(m_prev, jnp.max(s, axis=-1, keepdims=True))
        alpha = jnp.exp(m_prev - m_new)
        p = jnp.exp(s - m_new)                                      # f32
        l_scr[...] = alpha * l_scr[...] + jnp.sum(p, axis=-1, keepdims=True)
        acc_scr[...] = alpha * acc_scr[...] + jnp.dot(
            p.astype(v.dtype), v, preferred_element_type=jnp.float32)
        m_scr[...] = m_new

    processed = ki * tk < (qi + 1) * tq            # tile not fully above diag
    interior = (ki + 1) * tk - 1 <= qi * tq        # tile fully below diag

    @pl.when(jnp.logical_and(processed, jnp.logical_not(interior)))
    def _diag_tile():                              # crosses diagonal -> mask
        s = _scores()
        row = qi * tq + lax.broadcasted_iota(jnp.int32, (tq, tk), 0)
        col = ki * tk + lax.broadcasted_iota(jnp.int32, (tq, tk), 1)
        _online_update(jnp.where(row >= col, s, _NEG_INF))

    @pl.when(interior)
    def _interior_tile():                          # no iota / compare / select
        _online_update(_scores())

    @pl.when(ki == n_kv - 1)
    def _head_finalize():                          # fold head into projection
        if approx:
            y = acc_scr[...] * pl.reciprocal(l_scr[...], approx=True)
        else:
            y = acc_scr[...] / l_scr[...]
        out_scr[...] += jnp.dot(y.astype(wo_ref.dtype), wo_ref[0],
                                preferred_element_type=jnp.float32)

    @pl.when(jnp.logical_and(h == n_heads - 1, ki == n_kv - 1))
    def _store():
        o_ref[0] = out_scr[...].astype(o_ref.dtype)


# ---------------------------------------------------------------------------
# Wrapper
# ---------------------------------------------------------------------------
def prepare_weights(w_lift, w_proj, n_heads, compute_dtype=jnp.bfloat16):
    """One-time weight re-layout + cast (hoisted out of the per-call path).

      w_qkv[s, h, e, d] = W_lift[s*E + h*D + d, e]  -> q/k/v_h = x @ w_qkv[s, h]
      w_out[h, d, e]    = W_proj[e, h*D + d]        -> out = sum_h y_h @ w_out[h]
    """
    three_e, n_embed = w_lift.shape
    assert three_e == 3 * n_embed and n_embed % n_heads == 0
    head_dim = n_embed // n_heads
    w_qkv = (w_lift.reshape(3, n_heads, head_dim, n_embed)
             .transpose(0, 1, 3, 2).astype(compute_dtype))
    w_out = (jnp.swapaxes(w_proj, 0, 1)
             .reshape(n_heads, head_dim, n_embed).astype(compute_dtype))
    return w_qkv, w_out


def causal_self_attention(x, w_qkv, w_out, *,
                          q_tile=512, kv_tile=512, t_tile=512):
    n_batch, n_tokens, n_embed = x.shape
    _, n_heads, _, head_dim = w_qkv.shape
    assert n_heads * head_dim == n_embed
    compute_dtype = w_qkv.dtype
    out_dtype = x.dtype
    scale = 1.0 / math.sqrt(head_dim)
    vmem_limit = _vmem_limit_bytes()

    x_c = x.astype(compute_dtype)

    tt = _pick_tile(n_tokens, t_tile)
    tq = _pick_tile(n_tokens, q_tile)
    tk = _pick_tile(n_tokens, kv_tile)

    head_shape = jax.ShapeDtypeStruct(
        (n_batch, n_heads, n_tokens, head_dim), compute_dtype)

    # --- 1) QKV lift into head-major layout --------------------------------
    # Grid (b, t, h): the x tile block index is constant across the inner head
    # sweep (DMA elided); larger tt amortizes W_lift re-fetch per (b, t).
    q, k, v = pl.pallas_call(
        functools.partial(_qkv_kernel, scale=scale),
        out_shape=(head_shape, head_shape, head_shape),
        grid_spec=pltpu.PrefetchScalarGridSpec(
            num_scalar_prefetch=0,
            grid=(n_batch, n_tokens // tt, n_heads),
            in_specs=[
                pl.BlockSpec((1, tt, n_embed), lambda b, t, h: (b, t, 0)),
                pl.BlockSpec((3, 1, n_embed, head_dim),
                             lambda b, t, h: (0, h, 0, 0)),
            ],
            out_specs=[
                pl.BlockSpec((1, 1, tt, head_dim), lambda b, t, h: (b, h, t, 0)),
                pl.BlockSpec((1, 1, tt, head_dim), lambda b, t, h: (b, h, t, 0)),
                pl.BlockSpec((1, 1, tt, head_dim), lambda b, t, h: (b, h, t, 0)),
            ],
        ),
        compiler_params=pltpu.CompilerParams(
            dimension_semantics=("parallel", "parallel", "parallel"),
            vmem_limit_bytes=vmem_limit),
    )(x_c, w_qkv)
    # TODO(synk): pack heads for lane-dense q/k/v stores when head_dim < 128.

    # Clamp K/V block index to the causal limit: tiles fully above the
    # diagonal re-request the previous block, so the pipeline elides the DMA.
    def _kv_index(b, qi, h, ki):
        k_max = ((qi + 1) * tq - 1) // tk
        return (b, h, jnp.minimum(ki, k_max), 0)

    # --- 2) fused flash attention + head-merge + output projection ---------
    out = pl.pallas_call(
        functools.partial(_flash_proj_kernel, tq=tq, tk=tk,
                          approx=(compute_dtype != jnp.float32)),
        out_shape=jax.ShapeDtypeStruct((n_batch, n_tokens, n_embed), out_dtype),
        grid_spec=pltpu.PrefetchScalarGridSpec(
            num_scalar_prefetch=0,
            grid=(n_batch, n_tokens // tq, n_heads, n_tokens // tk),
            in_specs=[
                pl.BlockSpec((1, 1, tq, head_dim),
                             lambda b, qi, h, ki: (b, h, qi, 0)),
                pl.BlockSpec((1, 1, tk, head_dim), _kv_index),
                pl.BlockSpec((1, 1, tk, head_dim), _kv_index),
                pl.BlockSpec((1, head_dim, n_embed),
                             lambda b, qi, h, ki: (h, 0, 0)),
            ],
            out_specs=pl.BlockSpec((1, tq, n_embed),
                                   lambda b, qi, h, ki: (b, qi, 0)),
            scratch_shapes=[
                pltpu.VMEM((tq, 1), jnp.float32),          # running max
                pltpu.VMEM((tq, 1), jnp.float32),          # running sum
                pltpu.VMEM((tq, head_dim), jnp.float32),   # per-head acc
                pltpu.VMEM((tq, n_embed), jnp.float32),    # projected out acc
            ],
        ),
        compiler_params=pltpu.CompilerParams(
            dimension_semantics=("parallel", "parallel",
                                 "arbitrary", "arbitrary"),
            vmem_limit_bytes=vmem_limit),
    )(q, k, v, w_out)

    return out


def _reference(x, w_lift, w_proj, n_heads):
    """Pure-JAX reference matching the PyTorch forward semantics."""
    n_batch, n_tokens, n_embed = x.shape
    head_dim = n_embed // n_heads
    qkv = x @ w_lift.T                               # (B, T, 3E)
    q, k, v = jnp.split(qkv, 3, axis=-1)

    def split_heads(t):
        return t.reshape(n_batch, n_tokens, n_heads, head_dim).transpose(0, 2, 1, 3)

    q, k, v = split_heads(q), split_heads(k), split_heads(v)
    a = (q @ jnp.swapaxes(k, -1, -2)) / math.sqrt(head_dim)
    mask = jnp.tril(jnp.ones((n_tokens, n_tokens), dtype=bool))[None, None]
    a = jnp.where(mask, a, -jnp.inf)
    a = jax.nn.softmax(a, axis=-1)
    y = (a @ v).transpose(0, 2, 1, 3).reshape(n_batch, n_tokens, n_embed)
    return y @ w_proj.T


if __name__ == "__main__":
    # Small config consistent with the module: n_embed divisible by n_heads.
    n_batch, n_tokens, n_embed, n_heads = 2, 16, 32, 4

    key = jax.random.PRNGKey(0)
    kx, kl, kp = jax.random.split(key, 3)

    x = jax.random.normal(kx, (n_batch, n_tokens, n_embed), dtype=jnp.float32)
    w_lift = jax.random.normal(kl, (3 * n_embed, n_embed), dtype=jnp.float32) * 0.02
    w_proj = jax.random.normal(kp, (n_embed, n_embed), dtype=jnp.float32) * 0.02

    ref = _reference(x, w_lift, w_proj, n_heads)

    # f32 path with tiny tiles: exercises multi-tile online softmax, the
    # masked/unmasked tile split, causal DMA clamping and the fused
    # head-reduction projection.
    wq32, wo32 = prepare_weights(w_lift, w_proj, n_heads,
                                 compute_dtype=jnp.float32)
    out_f32 = causal_self_attention(x, wq32, wo32, q_tile=8, kv_tile=8)
    out_f32 = jax.block_until_ready(out_f32)
    assert out_f32.shape == (n_batch, n_tokens, n_embed)
    assert jnp.allclose(out_f32, ref, atol=1e-4, rtol=1e-4), "f32 mismatch vs reference"

    # Default bf16-MXU-operand path (f32 accumulation) -- looser tolerance.
    wqb, wob = prepare_weights(w_lift, w_proj, n_heads)
    out_bf16 = causal_self_attention(x, wqb, wob)
    out_bf16 = jax.block_until_ready(out_bf16)
    assert out_bf16.shape == (n_batch, n_tokens, n_embed)
    assert jnp.allclose(out_bf16, ref, atol=5e-3, rtol=5e-2), "bf16 mismatch vs reference"

    print("KERNEL_OK")
</pallas_src>

<mosaic_0001>
module attributes {stable_mosaic.version = 11 : i64} {
  func.func @_qkv_kernel(%arg0: i32, %arg1: i32, %arg2: i32, %arg3: memref<1x16x32xf32, #tpu.memory_space<vmem>>, %arg4: memref<3x1x32x8xf32, #tpu.memory_space<vmem>>, %arg5: memref<1x1x16x8xf32, #tpu.memory_space<vmem>>, %arg6: memref<1x1x16x8xf32, #tpu.memory_space<vmem>>, %arg7: memref<1x1x16x8xf32, #tpu.memory_space<vmem>>) attributes {dimension_semantics = [#tpu.dimension_semantics<parallel>, #tpu.dimension_semantics<parallel>, #tpu.dimension_semantics<parallel>], iteration_bounds = array<i64: 2, 1, 4>, scalar_prefetch = 0 : i64, scratch_operands = 0 : i64, tpu.core_type = #tpu.core_type<tc>, window_params = [{transform_indices = @transform_0, window_bounds = array<i64: 1, 16, 32>}, {transform_indices = @transform_1, window_bounds = array<i64: 3, 1, 32, 8>}, {transform_indices = @transform_2, window_bounds = array<i64: 1, 1, 16, 8>}, {transform_indices = @transform_3, window_bounds = array<i64: 1, 1, 16, 8>}, {transform_indices = @transform_4, window_bounds = array<i64: 1, 1, 16, 8>}]} {
    %c0 = arith.constant 0 : index
    %c0_0 = arith.constant 0 : index
    %c0_1 = arith.constant 0 : index
    %0 = vector.load %arg3[%c0, %c0_0, %c0_1] : memref<1x16x32xf32, #tpu.memory_space<vmem>>, vector<1x16x32xf32>
    %1 = vector.shape_cast %0 : vector<1x16x32xf32> to vector<16x32xf32>
    %c0_2 = arith.constant 0 : index
    %c0_3 = arith.constant 0 : index
    %c0_4 = arith.constant 0 : index
    %c0_5 = arith.constant 0 : index
    %2 = vector.load %arg4[%c0_2, %c0_3, %c0_4, %c0_5] : memref<3x1x32x8xf32, #tpu.memory_space<vmem>>, vector<1x1x32x8xf32>
    %3 = vector.shape_cast %2 : vector<1x1x32x8xf32> to vector<32x8xf32>
    %cst = arith.constant dense<0.000000e+00> : vector<16x8xf32>
    %4 = tpu.matmul %1, %3, %cst {dimension_numbers = #tpu.dot_dimension_numbers<[1], [0], [0], [1], [0, 0, 1, 1], [], []>} : vector<16x32xf32>, vector<32x8xf32>, vector<16x8xf32> -> vector<16x8xf32>
    %cst_6 = arith.constant 0.353553385 : f32
    %5 = vector.broadcast %cst_6 : f32 to vector<16x8xf32>
    %6 = arith.mulf %4, %5 : vector<16x8xf32>
    %c1 = arith.constant 1 : index
    %c0_7 = arith.constant 0 : index
    %c0_8 = arith.constant 0 : index
    %c0_9 = arith.constant 0 : index
    %7 = vector.load %arg4[%c1, %c0_7, %c0_8, %c0_9] : memref<3x1x32x8xf32, #tpu.memory_space<vmem>>, vector<1x1x32x8xf32>
    %8 = vector.shape_cast %7 : vector<1x1x32x8xf32> to vector<32x8xf32>
    %cst_10 = arith.constant dense<0.000000e+00> : vector<16x8xf32>
    %9 = tpu.matmul %1, %8, %cst_10 {dimension_numbers = #tpu.dot_dimension_numbers<[1], [0], [0], [1], [0, 0, 1, 1], [], []>} : vector<16x32xf32>, vector<32x8xf32>, vector<16x8xf32> -> vector<16x8xf32>
    %c2 = arith.constant 2 : index
    %c0_11 = arith.constant 0 : index
    %c0_12 = arith.constant 0 : index
    %c0_13 = arith.constant 0 : index
    %10 = vector.load %arg4[%c2, %c0_11, %c0_12, %c0_13] : memref<3x1x32x8xf32, #tpu.memory_space<vmem>>, vector<1x1x32x8xf32>
    %11 = vector.shape_cast %10 : vector<1x1x32x8xf32> to vector<32x8xf32>
    %cst_14 = arith.constant dense<0.000000e+00> : vector<16x8xf32>
    %12 = tpu.matmul %1, %11, %cst_14 {dimension_numbers = #tpu.dot_dimension_numbers<[1], [0], [0], [1], [0, 0, 1, 1], [], []>} : vector<16x32xf32>, vector<32x8xf32>, vector<16x8xf32> -> vector<16x8xf32>
    %c0_15 = arith.constant 0 : index
    %c0_16 = arith.constant 0 : index
    %c0_17 = arith.constant 0 : index
    %c0_18 = arith.constant 0 : index
    %13 = vector.load %arg5[%c0_15, %c0_16, %c0_17, %c0_18] : memref<1x1x16x8xf32, #tpu.memory_space<vmem>>, vector<1x1x16x8xf32>
    %14 = vector.shape_cast %13 : vector<1x1x16x8xf32> to vector<16x8xf32>
    %15 = vector.shape_cast %6 : vector<16x8xf32> to vector<1x1x16x8xf32>
    tpu.vector_store %arg5[%c0_15, %c0_16, %c0_17, %c0_18], %15 {strides = array<i32>} : memref<1x1x16x8xf32, #tpu.memory_space<vmem>>, vector<1x1x16x8xf32>,
    %c0_19 = arith.constant 0 : index
    %c0_20 = arith.constant 0 : index
    %c0_21 = arith.constant 0 : index
    %c0_22 = arith.constant 0 : index
    %16 = vector.load %arg6[%c0_19, %c0_20, %c0_21, %c0_22] : memref<1x1x16x8xf32, #tpu.memory_space<vmem>>, vector<1x1x16x8xf32>
    %17 = vector.shape_cast %16 : vector<1x1x16x8xf32> to vector<16x8xf32>
    %18 = vector.shape_cast %9 : vector<16x8xf32> to vector<1x1x16x8xf32>
    tpu.vector_store %arg6[%c0_19, %c0_20, %c0_21, %c0_22], %18 {strides = array<i32>} : memref<1x1x16x8xf32, #tpu.memory_space<vmem>>, vector<1x1x16x8xf32>,
    %c0_23 = arith.constant 0 : index
    %c0_24 = arith.constant 0 : index
    %c0_25 = arith.constant 0 : index
    %c0_26 = arith.constant 0 : index
    %19 = vector.load %arg7[%c0_23, %c0_24, %c0_25, %c0_26] : memref<1x1x16x8xf32, #tpu.memory_space<vmem>>, vector<1x1x16x8xf32>
    %20 = vector.shape_cast %19 : vector<1x1x16x8xf32> to vector<16x8xf32>
    %21 = vector.shape_cast %12 : vector<16x8xf32> to vector<1x1x16x8xf32>
    tpu.vector_store %arg7[%c0_23, %c0_24, %c0_25, %c0_26], %21 {strides = array<i32>} : memref<1x1x16x8xf32, #tpu.memory_space<vmem>>, vector<1x1x16x8xf32>,
    return
  }
  func.func @transform_0(%arg0: i32, %arg1: i32, %arg2: i32) -> (i32, i32, i32) {
    %c0_i32 = arith.constant 0 : i32
    %c0_i32_0 = arith.constant 0 : i32
    return %arg0, %arg1, %c0_i32 : i32, i32, i32
  }
  func.func @transform_1(%arg0: i32, %arg1: i32, %arg2: i32) -> (i32, i32, i32, i32) {
    %c0_i32 = arith.constant 0 : i32
    %c0_i32_0 = arith.constant 0 : i32
    %c0_i32_1 = arith.constant 0 : i32
    %c0_i32_2 = arith.constant 0 : i32
    return %c0_i32, %arg2, %c0_i32_0, %c0_i32_1 : i32, i32, i32, i32
  }
  func.func @transform_2(%arg0: i32, %arg1: i32, %arg2: i32) -> (i32, i32, i32, i32) {
    %c0_i32 = arith.constant 0 : i32
    %c0_i32_0 = arith.constant 0 : i32
    return %arg0, %arg2, %arg1, %c0_i32 : i32, i32, i32, i32
  }
  func.func @transform_3(%arg0: i32, %arg1: i32, %arg2: i32) -> (i32, i32, i32, i32) {
    %c0_i32 = arith.constant 0 : i32
    %c0_i32_0 = arith.constant 0 : i32
    return %arg0, %arg2, %arg1, %c0_i32 : i32, i32, i32, i32
  }
  func.func @transform_4(%arg0: i32, %arg1: i32, %arg2: i32) -> (i32, i32, i32, i32) {
    %c0_i32 = arith.constant 0 : i32
    %c0_i32_0 = arith.constant 0 : i32
    return %arg0, %arg2, %arg1, %c0_i32 : i32, i32, i32, i32
  }
}

</mosaic_0001>

<bundles_post_ra>
// kernel: tpu_custom_call.1
= control target key start
LH: loop header
LB: loop body
LE: loop exit
PB: predicated region body
PF: predicated region fallthrough
CT: control target
= control target key end

     0   :  { %s1186_s15 = smov 0   ;;  %s1188_s16 = smov 0   ;;  %s1293_s0 = inlined_call_operand.vmem [shape: f32[2,16,32], index: 0, kind: input, shape index: {}]   ;;  %s1294_s1 = inlined_call_operand.vmem [shape: f32[3,4,32,8], index: 1, kind: input, shape index: {}]   ;;  %s1295_s2 = inlined_call_operand.vmem [shape: f32[2,4,16,8], index: 2, kind: output, shape index: {0}]   ;;  %s1296_s3 = inlined_call_operand.vmem [shape: f32[2,4,16,8], index: 3, kind: output, shape index: {1}]   ;;  %s1297_s4 = inlined_call_operand.vmem [shape: f32[2,4,16,8], index: 4, kind: output, shape index: {2}]  }
   0x1   :  { %s1190_s17 = smov 0   ;;  %s1192_s18 = smov 0  }
   0x2   :  { %s1194_s19 = smov 0   ;;  %s1196_s20 = smov 0  }
   0x3   :  { %s1198_s21 = smov 0  }
   0x4 LB: > { %s27_s22 = sadd.s32 1, %s1151_s19  ;;  %s34_s23 = sadd.s32 1, %s1155_s20  ;;  %s1159_s21 = sphi %s1198_s21, %s15_s21   ;;  %s1155_s20 = sphi %s1196_s20, %s1303_s20   ;;  %s1151_s19 = sphi %s1194_s19, %s1302_s19   ;;  %s1147_s18 = sphi %s1192_s18, %s1301_s18   ;;  %s1143_s17 = sphi %s1190_s17, %s1300_s17   ;;  %s1139_s16 = sphi %s1188_s16, %s1299_s16   ;;  %s1135_s15 = sphi %s1186_s15, %s1298_s15  }
   0x5   : > { %p28_p0 = scmp.ge.s32.totalorder %s27_s22, 4  ;;  %s69_s24 = sadd.s32 1, %s1139_s16 }
   0x6   : > { %p76_p1 = scmp.ne.s32.totalorder %s1139_s16, %s1135_s15  ;;  %p77_p2 = scmp.eq.s32.totalorder %s1159_s21, 0 }
   0x7   : > { %s1305_s22 = smov (%p28_p0, %s27_s22), 0  ;;  %s1307_s23 = smov (!%p28_p0, %s34_s23), %s1155_s20 }
   0x8   : > { %s66_s25 = ssub.s32 %s1151_s19, %s1305_s22  ;;  %p78_p3 = por %p77_p2, %p76_p1 }
   0x9   : > { %p36_p4 = scmp.ge.s32.totalorder %s1307_s23, 2  ;;  %p67_p5 = scmp.eq.s32.totalorder %s66_s25, 0 }
   0xa   : > { %p939_p6 = scmp.ge.s32.totalorder %s1159_s21, 8 }
   0xb   : > { %s1309_s23 = smov (%p36_p4, %s1307_s23), 0 }
   0xc   : > { %s1235_s26 = scalar_select %p67_p5, %s1139_s16, %s69_s24  }
   0xd   : > { %192 = sbr.rel (%p939_p6) target bundleno = 31 (0x1f), region = 16 }
  0x14   : > { %208 = sbr.rel (!%p78_p3) target bundleno = 31 (0x1f), region = 24  ;;  %s210_s27 = sand.u32 (%p78_p3), 1, %s1139_s16  }
  0x15   : > { %s970_s28 = sshll.u32 (%p78_p3), %s1151_s19, 5  ;;  %s1047_s29 = smul.u32 (%p78_p3), 96, %s210_s27 }
  0x16   : > { %s215_s6 = scalar_lea.vmem (%p78_p3), %s1294_s1, %s970_s28 }
  0x17   : > { %v265_v0 = vld [vmem:[%s215_s6] sm:$0xff] (%p78_p3)  ;;  %v267_v1 = vld [vmem:[%s215_s6 + $0x8] sm:$0xff] (%p78_p3)  ;;  %v269_v2 = vld [vmem:[%s215_s6 + $0x10] sm:$0xff] (%p78_p3)  ;;  %s212_s7 = scalar_lea.vmem (%p78_p3), [#allocation2], %s1047_s29 }
  0x18   : > { %v271_v3 = vld [vmem:[%s215_s6 + $0x18] sm:$0xff] (%p78_p3)  ;;  %v273_v4 = vld [vmem:[%s215_s6 + $0x80] sm:$0xff] (%p78_p3)  ;;  %v275_v5 = vld [vmem:[%s215_s6 + $0x88] sm:$0xff] (%p78_p3)  ;;  %266 = vst [vmem:[%s212_s7] sm:$0xff] (%p78_p3), %v265_v0 }
  0x19   : > { %268 = vst [vmem:[%s212_s7 + $0x8] sm:$0xff] (%p78_p3), %v267_v1  ;;  %270 = vst [vmem:[%s212_s7 + $0x10] sm:$0xff] (%p78_p3), %v269_v2  ;;  %v277_v6 = vld [vmem:[%s215_s6 + $0x90] sm:$0xff] (%p78_p3)  ;;  %v279_v7 = vld [vmem:[%s215_s6 + $0x98] sm:$0xff] (%p78_p3) }
  0x1a   : > { %272 = vst [vmem:[%s212_s7 + $0x18] sm:$0xff] (%p78_p3), %v271_v3  ;;  %274 = vst [vmem:[%s212_s7 + $0x20] sm:$0xff] (%p78_p3), %v273_v4  ;;  %v281_v8 = vld [vmem:[%s215_s6 + $0x100] sm:$0xff] (%p78_p3)  ;;  %v283_v9 = vld [vmem:[%s215_s6 + $0x108] sm:$0xff] (%p78_p3) }
  0x1b   : > { %276 = vst [vmem:[%s212_s7 + $0x28] sm:$0xff] %v275_v5  ;;  %278 = vst [vmem:[%s212_s7 + $0x30] sm:$0xff] %v277_v6  ;;  %v285_v10 = vld [vmem:[%s215_s6 + $0x110] sm:$0xff]  ;;  %v287_v11 = vld [vmem:[%s215_s6 + $0x118] sm:$0xff] }
  0x1c   : > { %280 = vst [vmem:[%s212_s7 + $0x38] sm:$0xff] %v279_v7  ;;  %282 = vst [vmem:[%s212_s7 + $0x40] sm:$0xff] %v281_v8 }
  0x1d   : > { %284 = vst [vmem:[%s212_s7 + $0x48] sm:$0xff] %v283_v9  ;;  %286 = vst [vmem:[%s212_s7 + $0x50] sm:$0xff] %v285_v10 }
  0x1e   : > { %288 = vst [vmem:[%s212_s7 + $0x58] sm:$0xff] %v287_v11 }
  0x1f PF: > { %p942_p7 = scmp.ge.s32.totalorder %s1159_s21, 1  ;;  %p293_p8 = scmp.lt.s32.totalorder %s1159_s21, 9 }
  0x21   : > { %p294_p9 = pnand %p942_p7, %p293_p8 }
  0x22   : > { %s300_s8 = sand.u32 (!%p294_p9), 1, %s1135_s15   ;;  %p369_p10 = scmp.lt.s32.totalorder (!%p294_p9), %s1147_s18, 1  ;;  %vm426_vm0 = vcmask (!%p294_p9), 261120   ;;  %vm670_vm1 = vcmask (!%p294_p9), 64512  }
  0x23   : > { %297 = sbr.rel (%p294_p9) target bundleno = 272 (0x110), region = 62  ;;  %p381_p11 = scmp.lt.s32.totalorder (!%p294_p9), %s1143_s17, 3 }
  0x24   : > { %s1048_s9 = smul.u32 (!%p294_p9), 96, %s300_s8 }
  0x26   : > { %s302_s10 = scalar_lea.vmem (!%p294_p9), [#allocation2], %s1048_s9 }
  0x27   : > { %v422_v12 = vld [vmem:[%s302_s10] sm:$0xff] (!%p294_p9)  ;;  %v423_v13 = vld [vmem:[%s302_s10 + $0x8] sm:$0xff] (!%p294_p9)  ;;  %v424_v14 = vld [vmem:[%s302_s10 + $0x10] sm:$0xff] (!%p294_p9) }
  0x28   : > { %v1023_v15 = vpack.c.bf16 (!%p294_p9), %v423_v13, %v422_v12  ;;  %v425_v16 = vld [vmem:[%s302_s10 + $0x18] sm:$0xff] (!%p294_p9)  ;;  %v956_v17 = vld [vmem:[%s302_s10 + $0x20] sm:$0xff] (!%p294_p9)  ;;  %v957_v18 = vld [vmem:[%s302_s10 + $0x28] sm:$0xff] (!%p294_p9) }
  0x29   : > { %v1027_v19 = vpack.c.bf16 (!%p294_p9), %v425_v16, %v424_v14  ;;  %v1031_v21 = vpack.c.bf16 (!%p294_p9), %v957_v18, %v956_v17  ;;  %v962_v22 = vld [vmem:[%s302_s10 + $0x40] sm:$0xff] (!%p294_p9)  ;;  %v963_v23 = vld [vmem:[%s302_s10 + $0x48] sm:$0xff] (!%p294_p9)  ;;  %v958_v24 = vld [vmem:[%s302_s10 + $0x30] sm:$0xff] (!%p294_p9) }
  0x2a   : > { %s1311_s18 = smov (!%p369_p10, %s1147_s18), 1  ;;  %1024 = vmatprep.subr.bf16.mxu0 %v1023_v15  ;;  %v959_v25 = vld [vmem:[%s302_s10 + $0x38] sm:$0xff]  ;;  %v1039_v27 = vpack.c.bf16 %v963_v23, %v962_v22  ;;  %v964_v28 = vld [vmem:[%s302_s10 + $0x50] sm:$0xff]  ;;  %s1313_s17 = smov (!%p381_p11, %s1143_s17), 3 }
  0x2b   : > { %s971_s11 = sshll.u32 %s1311_s18, 4  ;;  %1026 = vmatpush3.bf16.msra.mxu0 %v1023_v15  ;;  %1032 = vmatprep.subr.bf16.mxu1 %v1031_v21  ;;  %v1035_v26 = vpack.c.bf16 %v959_v25, %v958_v24  ;;  %v965_v29 = vld [vmem:[%s302_s10 + $0x58] sm:$0xff]  ;;  %s945_s15 = sshll.u32 %s1313_s17, 1 }
  0x2c   : > { %s376_s14 = scalar_lea.vmem %s1293_s0, %s971_s11  ;;  %1028 = vmatprep.subr.bf16.mxu0 %v1027_v19  ;;  %1034 = vmatpush3.bf16.msra.mxu1 %v1031_v21  ;;  %v1043_v31 = vpack.c.bf16 %v965_v29, %v964_v28  ;;  %s946_s24 = sshll.u32 %s1311_s18, 3 }
  0x2d   : > { %v420_v20 = vld [vmem:[%s376_s14] sm:$0xff]  ;;  %1036 = vmatprep.subr.bf16.mxu1 %v1035_v26  ;;  %v421_v30 = vld [vmem:[%s376_s14 + $0x8] sm:$0xff]  ;;  %s388_s25 = sadd.s32 %s946_s24, %s945_s15 }
  0x2e   : > { %998 = vmatprep.mubr.msk.f32.mxu0 %vm426_vm0, %v420_v20  ;;  %1009 = vmatprep.mubr.msk.f32.mxu1 %vm426_vm0, %v420_v20  ;;  %s947_s27 = sshll.u32 %s388_s25, 3 }
  0x2f   : > { %1030 = vmatpush3.bf16.msra.mxu0 %v1027_v19  ;;  %s404_s30 = scalar_lea.vmem %s1296_s3, %s947_s27  ;;  %s390_s7 = scalar_lea.vmem %s1295_s2, %s947_s27 }
  0x30   : > { %1040 = vmatprep.subr.bf16.mxu0 %v1039_v27  ;;  %1038 = vmatpush3.bf16.msra.mxu1 %v1035_v26  ;;  %s418_s8 = scalar_lea.vmem %s1297_s4, %s947_s27 }
  0x32   : > { %999 = vmatmul.mubr.msk.f32.vlgmr.msra.gmra.mrb[0].mxu0 %vm426_vm0, %v421_v30 }
  0x33   : > { %1042 = vmatpush3.bf16.msra.mxu0 %v1039_v27  ;;  %1010 = vmatmul.mubr.msk.f32.vlgmr.msra.gmra.mrb[0].mxu1 %vm426_vm0, %v421_v30 }
  0x34   : > { %1044 = vmatprep.subr.bf16.mxu0 %v1043_v31  ;;  %1020 = vmatprep.mubr.msk.f32.mxu0 %vm426_vm0, %v420_v20 }
  0x37   : > { %1046 = vmatpush3.bf16.msra.mxu0 %v1043_v31 }
  0x3a   : > { %1021 = vmatmul.mubr.msk.f32.vlgmr.msra.gmra.mrb[2].mxu0 %vm426_vm0, %v421_v30 }
 0x105   : > { %v1000_v32 = vpop.f32.mrb[0].mxu0 }
 0x106   : > { %v509_v33 = vmul.f32 0.35355338, %v1000_v32  ;;  %v499_v34 = vpop.f32.mrb[1].mxu0  ;;  %v1011_v35 = vpop.f32.mrb[0].mxu1 }
 0x107   : > { %v508_v36 = vmul.f32 0.35355338, %v499_v34  ;;  %674 = vst.msk [vmem:[%s404_s30 + $0x8] sm:$0xff] %vm670_vm1, %v1011_v35  ;;  %v581_v37 = vpop.f32.mrb[1].mxu1 }
 0x108   : > { %672 = vst.msk [vmem:[%s390_s7 + $0x8] sm:$0xff] %vm670_vm1, %v509_v33  ;;  %673 = vst.msk [vmem:[%s404_s30] sm:$0xff] %vm670_vm1, %v581_v37 }
 0x109   : > { %671 = vst.msk [vmem:[%s390_s7] sm:$0xff] %vm670_vm1, %v508_v36 }
 0x10d   : > { %v1022_v38 = vpop.f32.mrb[2].mxu0 }
 0x10e   : > { %676 = vst.msk [vmem:[%s418_s8 + $0x8] sm:$0xff] %vm670_vm1, %v1022_v38  ;;  %v661_v39 = vpop.f32.mrb[3].mxu0 }
 0x10f   : > { %675 = vst.msk [vmem:[%s418_s8] sm:$0xff] %vm670_vm1, %v661_v39 }
 0x110 PF: > { %s15_s21 = sadd.s32 1, %s1159_s21   ;;  %s1298_s15 = smov %s1139_s16 }
 0x111   : > { %p12_p12 = scmp.ge.s32.totalorder %s15_s21, 10   ;;  %s1299_s16 = smov %s1235_s26 }
 0x112   : > { %s1300_s17 = smov %s1151_s19  ;;  %s1301_s18 = smov %s1155_s20 }
 0x113   : > { %s1302_s19 = smov %s1305_s22  ;;  %s1303_s20 = smov %s1309_s23 }
 0x114   :  { %14 = sbr.rel (!%p12_p12) target bundleno = 4 (0x4), region = 130 }

</bundles_post_ra>
